<compile_context>
chip_gen: v5e
topology: v5e:2x2
jax: 0.10.0
libtpu: 0.0.40
codegen_flags: <defaults>
</compile_context>

<pallas_src>
import jax
import jax.numpy as jnp
import numpy as np
from jax.experimental import pallas as pl
from jax.experimental.pallas import tpu as pltpu

# ----- hyperparameters consistent with TextCNN.__init__ (multichannel=False, eval mode) -----
CLASS_NUM = 4            # args.class_num
FILTER_NUM = 8           # args.filter_num
FILTER_SIZES = (3, 5)    # args.filter_sizes (must be odd: residual add needs L2 == L1)
VOCAB_SIZE = 32          # args.vocabulary_size
EMBED_DIM = 16           # args.embedding_dim
BATCH = 2
SEQ_LEN = 16
F_HALF = FILTER_NUM // 2
BN_EPS = 1e-5

N_SIZES = len(FILTER_SIZES)
MAX_SIZE = max(FILTER_SIZES)
MAXPAD = (MAX_SIZE - 1) // 2                 # largest conv2 padding
L1MAX = SEQ_LEN - min(FILTER_SIZES) + 1      # longest conv1 output length (14)
LP = 24                                      # per-batch row block (8-aligned, >= L1MAX + 2*MAXPAD)
R = BATCH * LP                               # total activation rows (48)

CONVW = N_SIZES * F_HALF                     # conv1 columns for all filter sizes (8)
DSW = N_SIZES * FILTER_NUM                   # downsample / conv2 columns (16)
W1W = CONVW + DSW                            # packed layer-1 output width (24)
NOFF = 2 * MAXPAD + 1                        # number of layer-2 offsets (5)
W2OFF = MAX_SIZE * EMBED_DIM                 # row offset of layer-2 weights in the slab (80)
FCOFF = W2OFF + NOFF * CONVW                 # row offset of fc weights (120)
WSLAB_ROWS = FCOFF + DSW                     # total weight-slab rows (136)

assert all(s % 2 == 1 for s in FILTER_SIZES), (
    "residual add (convs2 + downsample) requires odd filter sizes so that the "
    "padded conv2 output length matches the conv1 output length")
assert LP % 8 == 0 and LP >= L1MAX + 2 * MAXPAD


def _textcnn_kernel(xcol_ref, w_ref, aux_ref, out_ref):
    """convs1+downsamples (one fused matmul), conv2 via per-offset shifted matmuls,
    BN shifts, ReLU, residual, masked global max pool, and the final FC."""
    xcol = xcol_ref[...]                                   # (R, MAX*E)       bf16
    w = w_ref[...]                                         # (WSLAB_ROWS, 24) bf16 (scales folded)
    aux = aux_ref[...]                                     # (R+2, 24)        f32

    mask1 = aux[0:R, 0:CONVW]                              # (R, 8)  valid conv1 rows
    mask2 = aux[0:R, CONVW:W1W]                            # (R, 16) valid conv2/pool rows
    sh1 = aux[R:R + 1, 0:CONVW]                            # (1, 8)  BN1 shift (bias folded)
    sh2 = aux[R:R + 1, CONVW:W1W]                          # (1, 16) BN2 + downsample-BN shift
    fcb = aux[R + 1:R + 2, 0:CLASS_NUM]                    # (1, 4)  fc bias (kept f32)

    # ---- layer 1: convs1[i] + downsamples[i] for ALL filter sizes in ONE matmul ----
    y1 = jnp.dot(xcol, w[0:W2OFF, :],
                 preferred_element_type=jnp.float32)       # (R, 24) f32
    h1 = jnp.maximum(y1[:, 0:CONVW] + sh1, 0.0) * mask1    # BN1 + ReLU, zero pad/invalid rows
    acc = y1[:, CONVW:W1W]                                 # downsample path (scale pre-folded)

    # ---- layer 2: conv2 (padding folded into the row layout) as per-offset matmuls ----
    h1b = h1.astype(jnp.bfloat16)
    zpad = jnp.zeros((MAXPAD, CONVW), jnp.bfloat16)
    h1e = jnp.concatenate([zpad, h1b, zpad], axis=0)       # (R + 2*MAXPAD, 8)
    for j in range(NOFF):                                  # offsets d = j - MAXPAD
        acc = acc + jnp.dot(h1e[j:j + R, :],
                            w[W2OFF + j * CONVW:W2OFF + (j + 1) * CONVW, 0:DSW],
                            preferred_element_type=jnp.float32)
    h2 = jnp.maximum(acc + sh2, 0.0) * mask2               # BN2 + residual + ReLU, masked

    # ---- global max pool over each batch's 8-aligned row block (h2 >= 0, invalid rows are 0) ----
    feat = jnp.concatenate(
        [jnp.max(h2[b * LP:(b + 1) * LP, :], axis=0, keepdims=True) for b in range(BATCH)],
        axis=0)                                            # (B, 16) f32

    # dropout: identity (eval mode)
    out_ref[...] = jnp.dot(feat.astype(jnp.bfloat16), w[FCOFF:FCOFF + DSW, 0:CLASS_NUM],
                           preferred_element_type=jnp.float32) + fcb


def textcnn_forward(xcol, wslab, aux):
    flops = (2 * R * W2OFF * W1W                    # layer-1 matmul
             + 2 * NOFF * R * CONVW * DSW           # layer-2 matmuls
             + 2 * BATCH * DSW * CLASS_NUM)         # fc
    bytes_accessed = (R * W2OFF + WSLAB_ROWS * W1W) * 2 + (R + 2) * W1W * 4 \
        + BATCH * CLASS_NUM * 4
    # Gridless: total footprint is ~20 KiB and the kernel is latency-bound; a grid
    # (even 'parallel' for v7x's two TCs) only adds per-step overhead at this size.
    return pl.pallas_call(
        _textcnn_kernel,
        out_shape=jax.ShapeDtypeStruct((BATCH, CLASS_NUM), jnp.float32),
        in_specs=[pl.BlockSpec(memory_space=pltpu.MemorySpace.VMEM)] * 3,
        out_specs=pl.BlockSpec(memory_space=pltpu.MemorySpace.VMEM),
        cost_estimate=pl.CostEstimate(flops=flops, transcendentals=0,
                                      bytes_accessed=bytes_accessed),
    )(xcol, wslab, aux)


def build_xcol(x_tokens, emb_table):
    """XLA-side embedding gather that directly produces the layer-1 im2col slab
    (perf review #1): rows are laid out per batch in 8-aligned blocks of LP rows,
    with MAXPAD leading zero rows (conv2 padding) and zero trailing rows."""
    pos = np.arange(L1MAX)[:, None] + np.arange(MAX_SIZE)[None, :]      # (L1max, MAX)
    pos = np.minimum(pos, SEQ_LEN - 1)   # clipped taps only ever feed masked rows
    tok = x_tokens[:, pos]                                              # (B, L1max, MAX)
    g = emb_table[tok].reshape(BATCH, L1MAX, MAX_SIZE * EMBED_DIM)      # (B, L1max, MAX*E)
    xcol = jnp.zeros((BATCH, LP, MAX_SIZE * EMBED_DIM), emb_table.dtype)
    xcol = xcol.at[:, MAXPAD:MAXPAD + L1MAX, :].set(g)
    return xcol.reshape(BATCH * LP, MAX_SIZE * EMBED_DIM)               # (R, MAX*E) bf16


def init_params(key):
    """Generate PyTorch-equivalent raw f32 parameters and pack the folded kernel slabs."""
    keys = iter(jax.random.split(key, 80))

    def nrm(shape, scale=0.1):
        return scale * jax.random.normal(next(keys), shape, jnp.float32)

    def bn_params(c):
        gamma = 1.0 + nrm((c,))
        beta = nrm((c,))
        mean = nrm((c,))
        var = 0.5 + jax.random.uniform(next(keys), (c,), jnp.float32)
        return gamma, beta, mean, var

    raw = {'w1': [], 'b1': [], 'wds': [], 'bds': [], 'w2': [], 'b2': [],
           'bn1': [], 'bnds': [], 'bn2': []}
    raw['emb'] = nrm((VOCAB_SIZE, EMBED_DIM), 1.0).astype(jnp.bfloat16)
    for size in FILTER_SIZES:
        raw['w1'].append(nrm((size, EMBED_DIM, F_HALF)))    # Conv2d(1, F/2, (size, E))
        raw['b1'].append(nrm((F_HALF,)))
        raw['wds'].append(nrm((size, EMBED_DIM, FILTER_NUM)))  # Conv2d(1, F, (size, E))
        raw['bds'].append(nrm((FILTER_NUM,)))
        raw['w2'].append(nrm((size, F_HALF, FILTER_NUM)))   # Conv2d(F/2, F, (size, 1))
        raw['b2'].append(nrm((FILTER_NUM,)))
        raw['bn1'].append(bn_params(F_HALF))
        raw['bnds'].append(bn_params(FILTER_NUM))
        raw['bn2'].append(bn_params(FILTER_NUM))
    raw['fc_w'] = nrm((N_SIZES * FILTER_NUM, CLASS_NUM))
    raw['fc_b'] = nrm((CLASS_NUM,))

    # ---- fold BN (inference) into weights (scale) and a single shift; pack slabs ----
    def fold(p, bias):
        g, be, m, v = p
        sc = g / jnp.sqrt(v + BN_EPS)
        return sc, be + (bias - m) * sc

    wslab = np.zeros((WSLAB_ROWS, W1W), np.float32)
    aux = np.zeros((R + 2, W1W), np.float32)
    for i, size in enumerate(FILTER_SIZES):
        sc1, sh1 = fold(raw['bn1'][i], raw['b1'][i])
        scds, shds = fold(raw['bnds'][i], raw['bds'][i])
        sc2, sh2 = fold(raw['bn2'][i], raw['b2'][i])
        pad = (size - 1) // 2
        L1_i = SEQ_LEN - size + 1

        # layer-1 weights (conv1 and downsample), scales folded, tap-major rows
        w1f = np.asarray((raw['w1'][i] * sc1).reshape(size * EMBED_DIM, F_HALF))
        wdsf = np.asarray((raw['wds'][i] * scds).reshape(size * EMBED_DIM, FILTER_NUM))
        wslab[:size * EMBED_DIM, i * F_HALF:(i + 1) * F_HALF] = w1f
        wslab[:size * EMBED_DIM, CONVW + i * FILTER_NUM:CONVW + (i + 1) * FILTER_NUM] = wdsf

        # layer-2 weights per output offset d (block-diagonal over filter sizes)
        w2f = np.asarray(raw['w2'][i] * sc2)                # (size, F/2, F)
        for j in range(NOFF):
            k = (j - MAXPAD) + pad
            if 0 <= k < size:
                r0 = W2OFF + j * CONVW + i * F_HALF
                wslab[r0:r0 + F_HALF, i * FILTER_NUM:(i + 1) * FILTER_NUM] = w2f[k]

        # shifts (row R) and validity masks (rows 0:R)
        aux[R, i * F_HALF:(i + 1) * F_HALF] = np.asarray(sh1)
        aux[R, CONVW + i * FILTER_NUM:CONVW + (i + 1) * FILTER_NUM] = np.asarray(sh2 + shds)
        for b in range(BATCH):
            r0 = b * LP + MAXPAD
            aux[r0:r0 + L1_i, i * F_HALF:(i + 1) * F_HALF] = 1.0
            aux[r0:r0 + L1_i, CONVW + i * FILTER_NUM:CONVW + (i + 1) * FILTER_NUM] = 1.0

    wslab[FCOFF:FCOFF + N_SIZES * FILTER_NUM, :CLASS_NUM] = np.asarray(raw['fc_w'])
    aux[R + 1, :CLASS_NUM] = np.asarray(raw['fc_b'])        # fc bias kept in the f32 slab

    return raw, jnp.asarray(wslab, jnp.bfloat16), jnp.asarray(aux, jnp.float32)


def reference_forward(x_tokens, raw):
    """Pure-f32 mirror of the PyTorch forward (eval mode, unfolded conv+BN),
    validating BN folding, packing, masking, residual, pooling, and the fc."""
    hp = jax.lax.Precision.HIGHEST

    def bn(xv, p):
        g, be, m, v = p
        return (xv - m) / jnp.sqrt(v + BN_EPS) * g + be

    emb = raw['emb'].astype(jnp.float32)[x_tokens]          # (B, S, E)
    pooled = []
    for i, size in enumerate(FILTER_SIZES):
        L1 = SEQ_LEN - size + 1
        pad = (size - 1) // 2
        w1, b1 = raw['w1'][i], raw['b1'][i]
        wds, bds = raw['wds'][i], raw['bds'][i]
        w2, b2 = raw['w2'][i], raw['b2'][i]

        c1 = sum(jnp.einsum('ble,ef->blf', emb[:, k:k + L1, :], w1[k], precision=hp)
                 for k in range(size)) + b1
        h1 = jnp.maximum(bn(c1, raw['bn1'][i]), 0.0)
        dsv = bn(sum(jnp.einsum('ble,ef->blf', emb[:, k:k + L1, :], wds[k], precision=hp)
                     for k in range(size)) + bds, raw['bnds'][i])
        h1p = jnp.pad(h1, ((0, 0), (pad, pad), (0, 0)))
        c2 = sum(jnp.einsum('blc,cf->blf', h1p[:, k:k + L1, :], w2[k], precision=hp)
                 for k in range(size)) + b2
        h2 = jnp.maximum(bn(c2, raw['bn2'][i]) + dsv, 0.0)
        pooled.append(jnp.max(h2, axis=1))
    feat = jnp.concatenate(pooled, axis=1)
    return jnp.dot(feat, raw['fc_w'], precision=hp) + raw['fc_b']


if __name__ == "__main__":
    key = jax.random.PRNGKey(0)
    kp, kx = jax.random.split(key)
    raw, wslab, aux = init_params(kp)
    x = jax.random.randint(kx, (BATCH, SEQ_LEN), 0, VOCAB_SIZE, dtype=jnp.int32)

    # TODO(synk): the nn.Embedding gather (+ im2col index pattern) stays in XLA; an
    # in-kernel gather would need a manual DMA which is not worth it at this size.
    xcol = build_xcol(x, raw['emb'])                        # (48, 80) bf16

    logits = textcnn_forward(xcol, wslab, aux)
    logits = jax.block_until_ready(logits)

    ref = reference_forward(x, raw)
    # Tolerance covers bf16 rounding of MXU operands (weights / h1 / feat); the
    # reference itself is full-f32 PyTorch semantics with unfolded BN parameters.
    np.testing.assert_allclose(np.asarray(logits), np.asarray(ref), rtol=2e-2, atol=4e-2)
    print("KERNEL_OK")
</pallas_src>

<mosaic_0001>
module attributes {stable_mosaic.version = 11 : i64} {
  func.func @_textcnn_kernel(%arg0: memref<48x80xbf16, #tpu.memory_space<vmem>>, %arg1: memref<136x24xbf16, #tpu.memory_space<vmem>>, %arg2: memref<50x24xf32, #tpu.memory_space<vmem>>, %arg3: memref<2x4xf32, #tpu.memory_space<vmem>>) attributes {dimension_semantics = [], scalar_prefetch = 0 : i64, scratch_operands = 0 : i64, tpu.core_type = #tpu.core_type<tc>} {
    %c0 = arith.constant 0 : index
    %c0_0 = arith.constant 0 : index
    %0 = vector.load %arg0[%c0, %c0_0] : memref<48x80xbf16, #tpu.memory_space<vmem>>, vector<48x80xbf16>
    %c0_1 = arith.constant 0 : index
    %c0_2 = arith.constant 0 : index
    %1 = vector.load %arg1[%c0_1, %c0_2] : memref<136x24xbf16, #tpu.memory_space<vmem>>, vector<136x24xbf16>
    %c0_3 = arith.constant 0 : index
    %c0_4 = arith.constant 0 : index
    %2 = vector.load %arg2[%c0_3, %c0_4] : memref<50x24xf32, #tpu.memory_space<vmem>>, vector<50x24xf32>
    %3 = vector.extract_strided_slice %2 {offsets = [0, 0], sizes = [48, 8], strides = [1, 1]} : vector<50x24xf32> to vector<48x8xf32>
    %4 = vector.extract_strided_slice %2 {offsets = [0, 8], sizes = [48, 16], strides = [1, 1]} : vector<50x24xf32> to vector<48x16xf32>
    %5 = vector.extract_strided_slice %2 {offsets = [48, 0], sizes = [1, 8], strides = [1, 1]} : vector<50x24xf32> to vector<1x8xf32>
    %6 = vector.extract_strided_slice %2 {offsets = [48, 8], sizes = [1, 16], strides = [1, 1]} : vector<50x24xf32> to vector<1x16xf32>
    %7 = vector.extract_strided_slice %2 {offsets = [49, 0], sizes = [1, 4], strides = [1, 1]} : vector<50x24xf32> to vector<1x4xf32>
    %8 = vector.extract_strided_slice %1 {offsets = [0, 0], sizes = [80, 24], strides = [1, 1]} : vector<136x24xbf16> to vector<80x24xbf16>
    %cst = arith.constant dense<0.000000e+00> : vector<48x24xf32>
    %9 = tpu.matmul %0, %8, %cst {dimension_numbers = #tpu.dot_dimension_numbers<[1], [0], [0], [1], [0, 0, 1, 1], [], []>} : vector<48x80xbf16>, vector<80x24xbf16>, vector<48x24xf32> -> vector<48x24xf32>
    %10 = vector.extract_strided_slice %9 {offsets = [0, 0], sizes = [48, 8], strides = [1, 1]} : vector<48x24xf32> to vector<48x8xf32>
    %11 = vector.broadcast %5 : vector<1x8xf32> to vector<48x8xf32>
    %12 = arith.addf %10, %11 : vector<48x8xf32>
    %cst_5 = arith.constant 0.000000e+00 : f32
    %13 = vector.broadcast %cst_5 : f32 to vector<48x8xf32>
    %14 = arith.maximumf %12, %13 : vector<48x8xf32>
    %15 = arith.mulf %14, %3 : vector<48x8xf32>
    %16 = vector.extract_strided_slice %9 {offsets = [0, 8], sizes = [48, 16], strides = [1, 1]} : vector<48x24xf32> to vector<48x16xf32>
    %17 = arith.truncf %15 : vector<48x8xf32> to vector<48x8xbf16>
    %cst_6 = arith.constant 0.000000e+00 : bf16
    %18 = vector.broadcast %cst_6 : bf16 to vector<2x8xbf16>
    %19 = tpu.concatenate %18, %17, %18 in 0 : vector<2x8xbf16>, vector<48x8xbf16>, vector<2x8xbf16> -> vector<52x8xbf16>
    %20 = vector.extract_strided_slice %19 {offsets = [0, 0], sizes = [48, 8], strides = [1, 1]} : vector<52x8xbf16> to vector<48x8xbf16>
    %21 = vector.extract_strided_slice %1 {offsets = [80, 0], sizes = [8, 16], strides = [1, 1]} : vector<136x24xbf16> to vector<8x16xbf16>
    %cst_7 = arith.constant dense<0.000000e+00> : vector<48x16xf32>
    %22 = tpu.matmul %20, %21, %cst_7 {dimension_numbers = #tpu.dot_dimension_numbers<[1], [0], [0], [1], [0, 0, 1, 1], [], []>} : vector<48x8xbf16>, vector<8x16xbf16>, vector<48x16xf32> -> vector<48x16xf32>
    %23 = arith.addf %16, %22 : vector<48x16xf32>
    %24 = vector.extract_strided_slice %19 {offsets = [1, 0], sizes = [48, 8], strides = [1, 1]} : vector<52x8xbf16> to vector<48x8xbf16>
    %25 = vector.extract_strided_slice %1 {offsets = [88, 0], sizes = [8, 16], strides = [1, 1]} : vector<136x24xbf16> to vector<8x16xbf16>
    %cst_8 = arith.constant dense<0.000000e+00> : vector<48x16xf32>
    %26 = tpu.matmul %24, %25, %cst_8 {dimension_numbers = #tpu.dot_dimension_numbers<[1], [0], [0], [1], [0, 0, 1, 1], [], []>} : vector<48x8xbf16>, vector<8x16xbf16>, vector<48x16xf32> -> vector<48x16xf32>
    %27 = arith.addf %23, %26 : vector<48x16xf32>
    %28 = vector.extract_strided_slice %19 {offsets = [2, 0], sizes = [48, 8], strides = [1, 1]} : vector<52x8xbf16> to vector<48x8xbf16>
    %29 = vector.extract_strided_slice %1 {offsets = [96, 0], sizes = [8, 16], strides = [1, 1]} : vector<136x24xbf16> to vector<8x16xbf16>
    %cst_9 = arith.constant dense<0.000000e+00> : vector<48x16xf32>
    %30 = tpu.matmul %28, %29, %cst_9 {dimension_numbers = #tpu.dot_dimension_numbers<[1], [0], [0], [1], [0, 0, 1, 1], [], []>} : vector<48x8xbf16>, vector<8x16xbf16>, vector<48x16xf32> -> vector<48x16xf32>
    %31 = arith.addf %27, %30 : vector<48x16xf32>
    %32 = vector.extract_strided_slice %19 {offsets = [3, 0], sizes = [48, 8], strides = [1, 1]} : vector<52x8xbf16> to vector<48x8xbf16>
    %33 = vector.extract_strided_slice %1 {offsets = [104, 0], sizes = [8, 16], strides = [1, 1]} : vector<136x24xbf16> to vector<8x16xbf16>
    %cst_10 = arith.constant dense<0.000000e+00> : vector<48x16xf32>
    %34 = tpu.matmul %32, %33, %cst_10 {dimension_numbers = #tpu.dot_dimension_numbers<[1], [0], [0], [1], [0, 0, 1, 1], [], []>} : vector<48x8xbf16>, vector<8x16xbf16>, vector<48x16xf32> -> vector<48x16xf32>
    %35 = arith.addf %31, %34 : vector<48x16xf32>
    %36 = vector.extract_strided_slice %19 {offsets = [4, 0], sizes = [48, 8], strides = [1, 1]} : vector<52x8xbf16> to vector<48x8xbf16>
    %37 = vector.extract_strided_slice %1 {offsets = [112, 0], sizes = [8, 16], strides = [1, 1]} : vector<136x24xbf16> to vector<8x16xbf16>
    %cst_11 = arith.constant dense<0.000000e+00> : vector<48x16xf32>
    %38 = tpu.matmul %36, %37, %cst_11 {dimension_numbers = #tpu.dot_dimension_numbers<[1], [0], [0], [1], [0, 0, 1, 1], [], []>} : vector<48x8xbf16>, vector<8x16xbf16>, vector<48x16xf32> -> vector<48x16xf32>
    %39 = arith.addf %35, %38 : vector<48x16xf32>
    %40 = vector.broadcast %6 : vector<1x16xf32> to vector<48x16xf32>
    %41 = arith.addf %39, %40 : vector<48x16xf32>
    %cst_12 = arith.constant 0.000000e+00 : f32
    %42 = vector.broadcast %cst_12 : f32 to vector<48x16xf32>
    %43 = arith.maximumf %41, %42 : vector<48x16xf32>
    %44 = arith.mulf %43, %4 : vector<48x16xf32>
    %45 = vector.extract_strided_slice %44 {offsets = [0, 0], sizes = [24, 16], strides = [1, 1]} : vector<48x16xf32> to vector<24x16xf32>
    %cst_13 = arith.constant dense<0xFF800000> : vector<16xf32>
    %46 = vector.multi_reduction <maximumf>, %45, %cst_13 [0] : vector<24x16xf32> to vector<16xf32>
    %47 = vector.shape_cast %46 : vector<16xf32> to vector<1x16xf32>
    %48 = vector.extract_strided_slice %44 {offsets = [24, 0], sizes = [24, 16], strides = [1, 1]} : vector<48x16xf32> to vector<24x16xf32>
    %cst_14 = arith.constant dense<0xFF800000> : vector<16xf32>
    %49 = vector.multi_reduction <maximumf>, %48, %cst_14 [0] : vector<24x16xf32> to vector<16xf32>
    %50 = vector.shape_cast %49 : vector<16xf32> to vector<1x16xf32>
    %51 = tpu.concatenate %47, %50 in 0 : vector<1x16xf32>, vector<1x16xf32> -> vector<2x16xf32>
    %52 = arith.truncf %51 : vector<2x16xf32> to vector<2x16xbf16>
    %53 = vector.extract_strided_slice %1 {offsets = [120, 0], sizes = [16, 4], strides = [1, 1]} : vector<136x24xbf16> to vector<16x4xbf16>
    %cst_15 = arith.constant dense<0.000000e+00> : vector<2x4xf32>
    %54 = tpu.matmul %52, %53, %cst_15 {dimension_numbers = #tpu.dot_dimension_numbers<[1], [0], [0], [1], [0, 0, 1, 1], [], []>} : vector<2x16xbf16>, vector<16x4xbf16>, vector<2x4xf32> -> vector<2x4xf32>
    %55 = vector.broadcast %7 : vector<1x4xf32> to vector<2x4xf32>
    %56 = arith.addf %54, %55 : vector<2x4xf32>
    %c0_16 = arith.constant 0 : index
    %c0_17 = arith.constant 0 : index
    %57 = vector.load %arg3[%c0_16, %c0_17] : memref<2x4xf32, #tpu.memory_space<vmem>>, vector<2x4xf32>
    tpu.vector_store %arg3[%c0_16, %c0_17], %56 {strides = array<i32>} : memref<2x4xf32, #tpu.memory_space<vmem>>, vector<2x4xf32>,
    return
  }
}

</mosaic_0001>

<bundles_post_ra>
// kernel: tpu_custom_call.1
= control target key start
LH: loop header
LB: loop body
LE: loop exit
PB: predicated region body
PF: predicated region fallthrough
CT: control target
= control target key end

     0   :  { %s994_s0 = inlined_call_operand.vmem [shape: bf16[48,80], index: 0, kind: input, shape index: {}]   ;;  %s995_s1 = inlined_call_operand.vmem [shape: bf16[136,24], index: 1, kind: input, shape index: {}]   ;;  %s996_s2 = inlined_call_operand.vmem [shape: f32[50,24], index: 2, kind: input, shape index: {}]   ;;  %s997_s3 = inlined_call_operand.hbm [shape: f32[2,4], index: 3, kind: output, shape index: {}]  }
   0x1   :  { %v719_v0 = vld [vmem:[%s995_s1 + $0x20] sm:$0xff]  ;;  %v718_v1 = vld [vmem:[%s995_s1 + $0x18] sm:$0xff] }
   0x2   :  { %104 = vmatpush.bf16.msra.mxu0 %v719_v0 }
   0x3   :  { %8 = vsyncpa [#allocation3], 0  ;;  %v717_v2 = vld [vmem:[%s995_s1 + $0x10] sm:$0xff]  ;;  %v716_v3 = vld [vmem:[%s995_s1 + $0x8] sm:$0xff]  ;;  %vm91_vm0 = vcmask 654336   ;;  %vm186_vm1 = vcmask 1043456  }
   0x4   :  { %v715_v4 = vld [vmem:[%s995_s1] sm:$0xff]  ;;  %v713_v6 = vld [vmem:[%s994_s0 + $0x8] sm:$0xff]  ;;  %v714_v7 = vld [vmem:[%s994_s0 + $0x10] sm:$0xff]  ;;  %vm165_vm2 = vcmask 1040384   ;;  %vm177_vm3 = vcmask 64512   ;;  %vm495_vm6 = vcmask 1045504  }
   0x5   :  { %v712_v5 = vld [vmem:[%s994_s0] sm:$0xff]  ;;  %v32_v8 = vld [vmem:[%s995_s1 + $0x28] sm:$0xf]  ;;  %v806_v10 = vld [vmem:[%s996_s2 + $0x30] sm:$0x3]  ;;  %vm337_vm7 = vcmask 1046528  }
   0x6   :  { %105 = vmatpush.bf16.msra.mxu0 %v718_v1  ;;  %v188_v9 = vsel %vm186_vm1, %v32_v8, 0  ;;  %v809_v11 = vperm.slane %v806_v10, 0  ;;  %v818_v15 = vld [vmem:[%s996_s2] sm:$0xff]  ;;  %v33_v17 = vld [vmem:[%s995_s1 + $0x2c] sm:$0xf]  ;;  %v842_v33 = vld [vmem:[%s996_s2 + $0x10] sm:$0xff] }
   0x7   :  { %721 = vmatpush.bf16.msra.mxu1 %v188_v9  ;;  %v279_v20 = vsel %vm186_vm1, %v33_v17, 0  ;;  %v832_v21 = vld [vmem:[%s996_s2 + $0x8] sm:$0xff]  ;;  %v35_v35 = vld [vmem:[%s995_s1 + $0x34] sm:$0xf]  ;;  %v36_v36 = vld [vmem:[%s995_s1 + $0x38] sm:$0xf] }
   0x8   :  { %288 = vmatpush.bf16.msra.mxu2 %v279_v20  ;;  %722 = vmatpush.bf16.msra.mxu3 %v279_v20  ;;  %v439_v38 = vsel %vm186_vm1, %v35_v35, 0  ;;  %v513_v39 = vsel %vm186_vm1, %v36_v36, 0  ;;  %v865_v42 = vld [vmem:[%s996_s2 + $0x18] sm:$0xff]  ;;  %v34_v47 = vld [vmem:[%s995_s1 + $0x30] sm:$0xf]  ;;  %v880_v57 = vld [vmem:[%s996_s2 + $0x20] sm:$0xff] }
   0x9   :  { %v355_v49 = vsel %vm186_vm1, %v34_v47, 0  ;;  %vm244_vm4 = vsmask.f32 7424  ;;  %v897_v1 = vld [vmem:[%s996_s2 + $0x28] sm:$0xff]  ;;  %vm411_vm5 = vsmask.f32 6400 }
   0xa   :  { %106 = vmatpush.bf16.msra.mxu0 %v717_v2  ;;  %s752_s2 = smov 8   ;;  %vm587_vm8 = vcmask 195648   ;;  %vm622_vm9 = vcmask 130048   ;;  %s754_s26 = smov [#allocation2]   ;;  %vm639_vm10 = vcmask 25600  }
   0xb   :  { %448 = vmatpush.bf16.msrb.mxu1 %v439_v38  ;;  %s646_s27 = sshll.u32 %s754_s26, 4  ;;  %s648_s30 = sshll.u32 %s997_s3, 4  ;;  %s647_s27 = int_to_ptr.vmem [resolvable:$true] %s646_s27  ;;  %s649_s30 = int_to_ptr.hbm [resolvable:$true] %s648_s30 }
   0xc   :  { %522 = vmatpush.bf16.msrb.mxu2 %v513_v39  ;;  %364 = vmatpush.bf16.msrb.mxu3 %v355_v49 }
   0xe   :  { %107 = vmatpush.bf16.msra.mxu0 %v716_v3 }
  0x12   :  { %108 = vmatpush.bf16.msra.mxu0 %v715_v4 }
  0x15   :  { %689 = vmatmul.msk.bf16.vlgmr.msra.gmra.mxu0 %vm91_vm0, %v712_v5 }
  0x16   :  { %197 = vmatpush.bf16.msrb.mxu0 %v188_v9 }
  0x25   :  { %690 = vmatmul.msk.bf16.gmra.mxu0 %vm91_vm0, %v713_v6 }
  0x35   :  { %691 = vmatmul.msk.bf16.gmra.mxu0 %vm91_vm0, %v714_v7 }
  0x92   :  { %v811_v12 = vpop.f32.mrf.mxu0 }
  0x93   :  { %v126_v13 = vadd.f32 %v809_v11, %v811_v12 }
  0x95   :  { %v132_v14 = vmax.f32 %v126_v13, 0.0 }
  0x97   :  { %v138_v18 = vmul.f32 %v132_v14, %v818_v15 }
  0x99   :  { %v144_v23 = vpack.c.bf16 %v138_v18, %v138_v18 }
  0x9a   :  { %v820_v16 = vpop.f32.mrf.mxu0 }
  0x9b   :  { %v127_v19 = vadd.f32 %v809_v11, %v820_v16  ;;  %v156_v27 = vunpack.c.l.b16 %v144_v23 }
  0x9d   :  { %v133_v22 = vmax.f32 %v127_v19, 0.0 }
  0x9f   :  { %v139_v24 = vmul.f32 %v133_v22, %v832_v21 }
  0xa1   :  { %v145_v25 = vpack.c.bf16 %v139_v24, %v139_v24 }
  0xa2   :  { %v835_v26 = vpop.f32.mrf.mxu0 }
  0xa3   :  { %v157_v28 = vunpack.c.l.b16 %v145_v25  ;;  %v128_v29 = vadd.f32 %v809_v11, %v835_v26 }
  0xa5   :  { %v162_v30 = vpack.c.b16 %v157_v28, %v156_v27  ;;  %v134_v31 = vmax.f32 %v128_v29, 0.0 }
  0xa7   :  { %v166_v32 = vrot.slane %v162_v30, 7  ;;  %v140_v40 = vmul.f32 %v134_v31, %v842_v33 }
  0xa9   :  { %v845_v34 = vsel %vm165_vm2, 0, %v166_v32  ;;  %v146_v44 = vpack.c.bf16 %v140_v40, %v140_v40 }
  0xaa   :  { %v853_v37 = vpop.f32.mrf.mxu0  ;;  %692 = vmatmul.msk.bf16.vlgmr.msrb.gmra.mxu0 %vm177_vm3, %v845_v34  ;;  %v247_v53 = vshll.u32 %v845_v34, 16  ;;  %v245_v61 = vshrl.u32 %v845_v34, 16  ;;  %v338_v47 = vrot.slane %v845_v34, 1 }
  0xab   :  { %v129_v41 = vadd.f32 %v809_v11, %v853_v37  ;;  %v158_v50 = vunpack.c.l.b16 %v146_v44  ;;  %v496_v44 = vrot.slane %v845_v34, 2 }
  0xac   :  { %v249_v58 = vrot.slane %v247_v53, 1  ;;  %v412_v36 = vrot.slane %v245_v61, 1  ;;  %v413_v38 = vrot.slane %v247_v53, 2 }
  0xad   :  { %v135_v43 = vmax.f32 %v129_v41, 0.0 }
  0xae   :  { %v250_v2 = vor.u32 %v249_v58, %v245_v61  ;;  %v414_v40 = vor.u32 %v413_v38, %v412_v36 }
  0xaf   :  { %v141_v45 = vmul.f32 %v135_v43, %v865_v42 }
  0xb1   :  { %v147_v46 = vpack.c.bf16 %v141_v45, %v141_v45 }
  0xb2   :  { %v871_v48 = vpop.f32.mrf.mxu0 }
  0xb3   :  { %v159_v51 = vunpack.c.l.b16 %v147_v46  ;;  %v130_v52 = vadd.f32 %v809_v11, %v871_v48 }
  0xb5   :  { %v163_v54 = vpack.c.b16 %v159_v51, %v158_v50  ;;  %v136_v56 = vmax.f32 %v130_v52, 0.0 }
  0xb7   :  { %v167_v55 = vrot.slane %v163_v54, 7  ;;  %v142_v63 = vmul.f32 %v136_v56, %v880_v57 }
  0xb9   :  { %v883_v59 = vsel %vm165_vm2, %v166_v32, %v167_v55  ;;  %v148_v6 = vpack.c.bf16 %v142_v63, %v142_v63 }
  0xba   :  { %v885_v60 = vpop.f32.mrf.mxu0  ;;  %693 = vmatmul.msk.bf16.vlgmr.msra.gmra.mxu1 %vm177_vm3, %v883_v59  ;;  %v251_v62 = vshll.u32 %v883_v59, 16  ;;  %v255_v20 = vshrl.u32 %v883_v59, 16  ;;  %v497_v43 = vrot.slane %v883_v59, 2  ;;  %v339_v45 = vrot.slane %v883_v59, 1 }
  0xbb   :  { %v131_v0 = vadd.f32 %v809_v11, %v885_v60  ;;  %v160_v9 = vunpack.c.l.b16 %v148_v6 }
  0xbc   :  { %v253_v3 = vrot.slane %v251_v62, 1  ;;  %v415_v32 = vrot.slane %v255_v20, 1  ;;  %v416_v35 = vrot.slane %v251_v62, 2  ;;  %v498_v46 = vsel %vm495_vm6, %v496_v44, %v497_v43 }
  0xbd   :  { %v137_v4 = vmax.f32 %v131_v0, 0.0  ;;  %v340_v49 = vsel %vm337_vm7, %v338_v47, %v339_v45 }
  0xbe   :  { %v254_v5 = vsel %vm244_vm4, %v250_v2, %v253_v3  ;;  %v257_v24 = vor.u32 %v255_v20, %v253_v3  ;;  %v417_v39 = vor.u32 %v416_v35, %v415_v32 }
  0xbf   :  { %v143_v7 = vmul.f32 %v137_v4, %v897_v1  ;;  %695 = vmatmul.msk.bf16.vlgmr.msra.gmra.mxu2 %vm177_vm3, %v254_v5 }
  0xc0   :  { %v418_v41 = vsel %vm411_vm5, %v414_v40, %v417_v39 }
  0xc1   :  { %v149_v8 = vpack.c.bf16 %v143_v7, %v143_v7 }
  0xc3   :  { %v161_v13 = vunpack.c.l.b16 %v149_v8 }
  0xc5   :  { %v164_v14 = vpack.c.b16 %v161_v13, %v160_v9 }
  0xc7   :  { %v169_v17 = vrot.slane %v164_v14, 7 }
  0xc9   :  { %v176_v18 = vsel %vm165_vm2, %v169_v17, 0  ;;  %v170_v19 = vsel %vm165_vm2, %v167_v55, %v169_v17 }
  0xca   :  { %694 = vmatmul.msk.bf16.gmra.mxu1 %vm177_vm3, %v170_v19  ;;  %v258_v22 = vshll.u32 %v170_v19, 16  ;;  %v265_v23 = vshll.u32 %v176_v18, 16  ;;  %v262_v27 = vshrl.u32 %v170_v19, 16  ;;  %v499_v54 = vrot.slane %v170_v19, 2 }
  0xcb   :  { %v341_v55 = vrot.slane %v170_v19, 1  ;;  %v423_v56 = vshrl.u32 %v176_v18, 16  ;;  %v501_v0 = vrot.slane %v176_v18, 2  ;;  %v343_v2 = vrot.slane %v176_v18, 1 }
  0xcc   :  { %v260_v25 = vrot.slane %v258_v22, 1  ;;  %v267_v30 = vrot.slane %v265_v23, 1  ;;  %v419_v50 = vrot.slane %v262_v27, 1  ;;  %v420_v51 = vrot.slane %v258_v22, 2 }
  0xcd   :  { %v500_v58 = vsel %vm495_vm6, %v497_v43, %v499_v54  ;;  %v342_v34 = vsel %vm337_vm7, %v339_v45, %v341_v55  ;;  %v425_v59 = vrot.slane %v423_v56, 1  ;;  %v426_v61 = vrot.slane %v265_v23, 2 }
  0xce   :  { %v261_v28 = vsel %vm244_vm4, %v257_v24, %v260_v25  ;;  %v264_v29 = vor.u32 %v262_v27, %v260_v25  ;;  %v421_v52 = vor.u32 %v420_v51, %v419_v50  ;;  %v502_v3 = vsel %vm495_vm6, %v499_v54, %v501_v0 }
  0xcf   :  { %696 = vmatmul.msk.bf16.gmra.mxu2 %vm177_vm3, %v261_v28  ;;  %v427_v62 = vor.u32 %v426_v61, %v425_v59  ;;  %v344_v4 = vsel %vm337_vm7, %v341_v55, %v343_v2 }
  0xd0   :  { %v268_v31 = vsel %vm244_vm4, %v264_v29, %v267_v30  ;;  %v422_v53 = vsel %vm411_vm5, %v417_v39, %v421_v52 }
  0xd1   :  { %697 = vmatmul.msk.bf16.vlgmr.msra.gmra.mxu3 %vm177_vm3, %v268_v31  ;;  %v428_v63 = vsel %vm411_vm5, %v421_v52, %v427_v62 }
  0xda   :  { %701 = vmatmul.msk.bf16.vlgmr.msrb.gmra.mxu1 %vm177_vm3, %v418_v41 }
  0xdf   :  { %704 = vmatmul.msk.bf16.vlgmr.msrb.gmra.mxu2 %vm177_vm3, %v498_v46 }
  0xe1   :  { %698 = vmatmul.msk.bf16.vlgmr.msrb.gmra.mxu3 %vm177_vm3, %v340_v49 }
  0xea   :  { %702 = vmatmul.msk.bf16.gmra.mxu1 %vm177_vm3, %v422_v53 }
  0xef   :  { %705 = vmatmul.msk.bf16.gmra.mxu2 %vm177_vm3, %v500_v58 }
  0xf1   :  { %699 = vmatmul.msk.bf16.gmra.mxu3 %vm177_vm3, %v342_v34 }
  0xfa   :  { %703 = vmatmul.msk.bf16.gmra.mxu1 %vm177_vm3, %v428_v63 }
  0xff   :  { %706 = vmatmul.msk.bf16.gmra.mxu2 %vm177_vm3, %v502_v3 }
 0x101   :  { %700 = vmatmul.msk.bf16.gmra.mxu3 %vm177_vm3, %v344_v4 }
 0x127   :  { %v199_v5 = vpop.f32.mrf.mxu0 }
 0x128   :  { %220 = vrot.lane.b32.xlu0 %v199_v5, %s752_s2 }
 0x12f   :  { %v201_v6 = vpop.f32.mrf.mxu0 }
 0x130   :  { %222 = vrot.lane.b32.xlu0 %v201_v6, %s752_s2 }
 0x137   :  { %v204_v7 = vpop.f32.mrf.mxu1 }
 0x138   :  { %224 = vrot.lane.b32.xlu2 %v204_v7, %s752_s2 }
 0x13f   :  { %v206_v8 = vpop.f32.mrf.mxu1 }
 0x140   :  { %226 = vrot.lane.b32.xlu1 %v206_v8, %s752_s2 }
 0x142   :  { %v290_v9 = vpop.f32.mrf.mxu2 }
 0x143   :  { %311 = vrot.lane.b32.xlu0 %v290_v9, %s752_s2 }
 0x147   :  { %v209_v13 = vpop.f32.mrf.mxu1 }
 0x148   :  { %228 = vrot.lane.b32.xlu1 %v209_v13, %s752_s2 }
 0x14a   :  { %v292_v14 = vpop.f32.mrf.mxu2 }
 0x14f   :  { %v211_v17 = vpop.f32.mrf.mxu1 }
 0x150   :  { %313 = vrot.lane.b32.xlu1 %v292_v14, %s752_s2  ;;  %230 = vrot.lane.b32.xlu2 %v211_v17, %s752_s2 }
 0x152   :  { %v295_v18 = vpop.f32.mrf.mxu2 }
 0x154   :  { %v300_v19 = vpop.f32.mrf.mxu3 }
 0x155   :  { %319 = vrot.lane.b32.xlu0 %v300_v19, %s752_s2 }
 0x157   :  { %v450_v20 = vpop.f32.mrf.mxu1 }
 0x158   :  { %315 = vrot.lane.b32.xlu1 %v295_v18, %s752_s2 }
 0x15a   :  { %v297_v22 = vpop.f32.mrf.mxu2 }
 0x15b   :  { %317 = vrot.lane.b32.xlu2 %v297_v22, %s752_s2 }
 0x15c   :  { %v302_v23 = vpop.f32.mrf.mxu3 }
 0x15d   :  { %471 = vrot.lane.b32.xlu0 %v450_v20, %s752_s2 }
 0x15f   :  { %v452_v24 = vpop.f32.mrf.mxu1 }
 0x160   :  { %473 = vrot.lane.b32.xlu1 %v452_v24, %s752_s2 }
 0x162   :  { %v524_v25 = vpop.f32.mrf.mxu2 }
 0x163   :  { %321 = vrot.lane.b32.xlu2 %v302_v23, %s752_s2 }
 0x164   :  { %v366_v27 = vpop.f32.mrf.mxu3 }
 0x165   :  { %545 = vrot.lane.b32.xlu0 %v524_v25, %s752_s2 }
 0x167   :  { %v455_v28 = vpop.f32.mrf.mxu1 }
 0x168   :  { %475 = vrot.lane.b32.xlu1 %v455_v28, %s752_s2 }
 0x16a   :  { %v526_v29 = vpop.f32.mrf.mxu2 }
 0x16c   :  { %v368_v30 = vpop.f32.mrf.mxu3 }
 0x16d   :  { %387 = vrot.lane.b32.xlu0 %v366_v27, %s752_s2 }
 0x16f   :  { %v457_v31 = vpop.f32.mrf.mxu1 }
 0x170   :  { %547 = vrot.lane.b32.xlu1 %v526_v29, %s752_s2  ;;  %477 = vrot.lane.b32.xlu2 %v457_v31, %s752_s2 }
 0x172   :  { %v529_v32 = vpop.f32.mrf.mxu2 }
 0x174   :  { %v371_v35 = vpop.f32.mrf.mxu3 }
 0x177   :  { %v460_v36 = vpop.f32.mrf.mxu1 }
 0x178   :  { %389 = vrot.lane.b32.xlu1 %v368_v30, %s752_s2  ;;  %479 = vrot.lane.b32.xlu0 %v460_v36, %s752_s2 }
 0x17a   :  { %v531_v38 = vpop.f32.mrf.mxu2 }
 0x17b   :  { %551 = vrot.lane.b32.xlu2 %v531_v38, %s752_s2 }
 0x17c   :  { %v373_v39 = vpop.f32.mrf.mxu3 }
 0x17f   :  { %v462_v41 = vpop.f32.mrf.mxu1 }
 0x180   :  { %391 = vrot.lane.b32.xlu1 %v371_v35, %s752_s2 }
 0x182   :  { %v534_v43 = vpop.f32.mrf.mxu2 }
 0x183   :  { %393 = vrot.lane.b32.xlu2 %v373_v39, %s752_s2 }
 0x184   :  { %v376_v40 = vpop.f32.mrf.mxu3 }
 0x185   :  { %395 = vrot.lane.b32.xlu0 %v376_v40, %s752_s2 }
 0x188   :  { %549 = vrot.lane.b32.xlu1 %v529_v32, %s752_s2 }
 0x18a   :  { %v536_v45 = vpop.f32.mrf.mxu2 }
 0x18b   :  { %481 = vrot.lane.b32.xlu2 %v462_v41, %s752_s2 }
 0x18c   :  { %v378_v44 = vpop.f32.mrf.mxu3 }
 0x18d   :  { %553 = vrot.lane.b32.xlu0 %v534_v43, %s752_s2 }
 0x192   :  { %v225_v46 = vpop.permute.xlu2 %224 }
 0x193   :  { %397 = vrot.lane.b32.xlu2 %v378_v44, %s752_s2  ;;  %v240_v29 = vadd.f32 %v225_v46, %v835_v26 }
 0x19a   :  { %v221_v47 = vpop.permute.xlu0 %220 }
 0x19b   :  { %555 = vrot.lane.b32.xlu2 %v536_v45, %s752_s2  ;;  %v238_v5 = vadd.f32 %v221_v47, %v811_v12 }
 0x1a2   :  { %v223_v51 = vpop.permute.xlu0 %222 }
 0x1a3   :  { %v239_v8 = vadd.f32 %v223_v51, %v820_v16 }
 0x1aa   :  { %v231_v50 = vpop.permute.xlu2 %230 }
 0x1ab   :  { %v243_v28 = vadd.f32 %v231_v50, %v885_v60 }
 0x1b2   :  { %v227_v49 = vpop.permute.xlu1 %226 }
 0x1b3   :  { %v241_v17 = vadd.f32 %v227_v49, %v853_v37 }
 0x1b5   :  { %v318_v53 = vpop.permute.xlu2 %317  ;;  %v312_v54 = vpop.permute.xlu0 %311 }
 0x1b6   :  { %v329_v9 = vadd.f32 %v312_v54, %v238_v5  ;;  %v332_v24 = vadd.f32 %v318_v53, %v241_v17 }
 0x1ba   :  { %v229_v52 = vpop.permute.xlu1 %228 }
 0x1bb   :  { %v242_v40 = vadd.f32 %v229_v52, %v871_v48  ;;  %v720_v48 = vld [vmem:[%s995_s1 + $0x3c] sm:$0xff]  ;;  %s753_s1 = smov 120  }
 0x1bc   :  { %633 = vmatpush.bf16.msra.mxu3 %v720_v48 }
 0x1bd   :  { %v322_v56 = vpop.permute.xlu2 %321 }
 0x1be   :  { %v334_v16 = vadd.f32 %v322_v56, %v243_v28 }
 0x1c2   :  { %v314_v55 = vpop.permute.xlu1 %313 }
 0x1c3   :  { %v330_v13 = vadd.f32 %v314_v55, %v239_v8 }
 0x1c7   :  { %v320_v58 = vpop.permute.xlu0 %319 }
 0x1c8   :  { %v333_v60 = vadd.f32 %v320_v58, %v242_v40 }
 0x1ca   :  { %v316_v34 = vpop.permute.xlu1 %315  ;;  %v478_v59 = vpop.permute.xlu2 %477 }
 0x1cb   :  { %v331_v32 = vadd.f32 %v316_v34, %v240_v29 }
 0x1cf   :  { %v472_v61 = vpop.permute.xlu0 %471 }
 0x1d2   :  { %v474_v62 = vpop.permute.xlu1 %473 }
 0x1d5   :  { %v552_v63 = vpop.permute.xlu2 %551 }
 0x1d7   :  { %v546_v2 = vpop.permute.xlu0 %545 }
 0x1da   :  { %v476_v0 = vpop.permute.xlu1 %475 }
 0x1dd   :  { %v394_v3 = vpop.permute.xlu2 %393 }
 0x1de   :  { %v408_v12 = vadd.f32 %v394_v3, %v332_v24 }
 0x1df   :  { %v388_v7 = vpop.permute.xlu0 %387 }
 0x1e0   :  { %v405_v14 = vadd.f32 %v388_v7, %v329_v9  ;;  %v492_v37 = vadd.f32 %v478_v59, %v408_v12 }
 0x1e2   :  { %v548_v4 = vpop.permute.xlu1 %547  ;;  %v489_v20 = vadd.f32 %v472_v61, %v405_v14  ;;  %v566_v45 = vadd.f32 %v552_v63, %v492_v37 }
 0x1e4   :  { %v563_v30 = vadd.f32 %v546_v2, %v489_v20  ;;  %v572_v55 = vadd.f32 %v566_v45, %v809_v11 }
 0x1e5   :  { %v482_v6 = vpop.permute.xlu2 %481 }
 0x1e6   :  { %v569_v38 = vadd.f32 %v563_v30, %v809_v11 }
 0x1e8   :  { %v575_v26 = vmax.f32 %v569_v38, 0.0 }
 0x1ea   :  { %v390_v18 = vpop.permute.xlu1 %389  ;;  %v480_v27 = vpop.permute.xlu0 %479  ;;  %v581_v52 = vmul.f32 %v575_v26, %v818_v15 }
 0x1eb   :  { %v406_v19 = vadd.f32 %v390_v18, %v330_v13 }
 0x1ed   :  { %v490_v22 = vadd.f32 %v474_v62, %v406_v19  ;;  %v398_v23 = vpop.permute.xlu2 %397  ;;  %v578_v62 = vmax.f32 %v572_v55, 0.0 }
 0x1ee   :  { %v410_v36 = vadd.f32 %v398_v23, %v334_v16 }
 0x1ef   :  { %v564_v25 = vadd.f32 %v548_v4, %v490_v22 }
 0x1f0   :  { %v494_v47 = vadd.f32 %v482_v6, %v410_v36  ;;  %v584_v6 = vmul.f32 %v578_v62, %v865_v42 }
 0x1f1   :  { %v570_v35 = vadd.f32 %v564_v25, %v809_v11 }
 0x1f2   :  { %v392_v31 = vpop.permute.xlu1 %391  ;;  %v599_v18 = vsel %vm587_vm8, %v584_v6, -inf }
 0x1f3   :  { %v407_v39 = vadd.f32 %v392_v31, %v331_v32  ;;  %v576_v41 = vmax.f32 %v570_v35, 0.0  ;;  %v612_v31 = vperm.slane %v806_v10, 1 }
 0x1f5   :  { %v556_v43 = vpop.permute.xlu2 %555  ;;  %v491_v46 = vadd.f32 %v476_v0, %v407_v39  ;;  %v582_v53 = vmul.f32 %v576_v41, %v832_v21  ;;  %v588_v0 = vsel %vm587_vm8, %v581_v52, -inf }
 0x1f6   :  { %v568_v49 = vadd.f32 %v556_v43, %v494_v47 }
 0x1f7   :  { %v396_v44 = vpop.permute.xlu0 %395  ;;  %v589_v59 = vsel %vm587_vm8, %v582_v53, -inf }
 0x1f8   :  { %v409_v50 = vadd.f32 %v396_v44, %v333_v60  ;;  %v574_v58 = vadd.f32 %v568_v49, %v809_v11  ;;  %v591_v4 = vmax.f32 %v588_v0, %v589_v59 }
 0x1fa   :  { %v550_v51 = vpop.permute.xlu1 %549  ;;  %v493_v34 = vadd.f32 %v480_v27, %v409_v50  ;;  %v580_v3 = vmax.f32 %v574_v58, 0.0 }
 0x1fb   :  { %v565_v54 = vadd.f32 %v550_v51, %v491_v46 }
 0x1fc   :  { %v586_v9 = vmul.f32 %v580_v3, %v897_v1 }
 0x1fd   :  { %v571_v56 = vadd.f32 %v565_v54, %v809_v11 }
 0x1fe   :  { %v601_v20 = vsel %vm587_vm8, %v586_v9, -inf }
 0x1ff   :  { %v577_v61 = vmax.f32 %v571_v56, 0.0  ;;  %v554_v21 = vpop.permute.xlu0 %553 }
 0x200   :  { %v567_v63 = vadd.f32 %v554_v21, %v493_v34 }
 0x201   :  { %v583_v2 = vmul.f32 %v577_v61, %v842_v33 }
 0x202   :  { %v573_v15 = vadd.f32 %v567_v63, %v809_v11 }
 0x203   :  { %v590_v5 = vsel %vm587_vm8, %v583_v2, -inf }
 0x204   :  { %v592_v7 = vmax.f32 %v591_v4, %v590_v5  ;;  %v579_v8 = vmax.f32 %v573_v15, 0.0 }
 0x206   :  { %v593_v13 = vrot.slane %v592_v7, 4  ;;  %v585_v14 = vmul.f32 %v579_v8, %v880_v57 }
 0x208   :  { %v594_v17 = vmax.f32 %v592_v7, %v593_v13  ;;  %v600_v33 = vsel %vm587_vm8, %v585_v14, -inf }
 0x209   :  { %v602_v19 = vmax.f32 %v599_v18, %v600_v33 }
 0x20a   :  { %v595_v11 = vrot.slane %v594_v17, 2 }
 0x20b   :  { %v603_v22 = vmax.f32 %v602_v19, %v601_v20 }
 0x20c   :  { %v596_v42 = vmax.f32 %v594_v17, %v595_v11 }
 0x20d   :  { %v604_v23 = vrot.slane %v603_v22, 4 }
 0x20e   :  { %v597_v27 = vrot.slane %v596_v42, 1 }
 0x20f   :  { %v605_v24 = vmax.f32 %v603_v22, %v604_v23 }
 0x210   :  { %v598_v12 = vmax.f32 %v596_v42, %v597_v27 }
 0x211   :  { %v606_v25 = vrot.slane %v605_v24, 2 }
 0x213   :  { %v607_v28 = vmax.f32 %v605_v24, %v606_v25 }
 0x215   :  { %v608_v1 = vrot.slane %v607_v28, 1 }
 0x217   :  { %v609_v29 = vmax.f32 %v607_v28, %v608_v1 }
 0x219   :  { %v610_v57 = vsel %vm165_vm2, %v598_v12, %v609_v29 }
 0x21a   :  { %v611_v30 = vpack.c.bf16 %v610_v57, %v610_v57 }
 0x21c   :  { %614 = vrot.lane.b32.xlu0 %v611_v30, %s753_s1 }
 0x28e   :  { %v615_v16 = vpop.permute.xlu0 %614 }
 0x28f   :  { %711 = vmatmul.msk.bf16.vlgmr.msra.gmra.mxu3 %vm622_vm9, %v615_v16 }
 0x312   :  { %v635_v32 = vpop.f32.mrf.mxu3 }
 0x313   :  { %v636_v35 = vadd.f32 %v635_v32, %v612_v31 }
 0x315   :  { %640 = vst.msk [vmem:[#allocation2] sm:$0x3] %vm639_vm10, %v636_v35 }
 0x316   :  { %651 = dma.vmem_to_hbm [thread:$0]  %s647_s27, 32, %s649_s30, [#allocation3]  }
 0x31a   :  { %v637_v37 = vpop.f32.mrf.mxu3 }
 0x31b   :  { %750 = dma.done.wait [#allocation3], 32  }
 0x31c   :  { %751 = vsyncadd [#allocation3], 4294967264 }
 0x31d   :  { %656 = vsyncpa [#allocation3], 1 }

</bundles_post_ra>
